<compile_context>
chip_gen: v7x
topology: tpu7x:2x2x1
jax: 0.10.0
libtpu: 0.0.40
codegen_flags: <defaults>
</compile_context>

<pallas_src>
import jax
import jax.numpy as jnp
from jax.experimental import pallas as pl
from jax.experimental.pallas import tpu as pltpu


def gelu(x):
    # tanh-approximation GELU (matches the common BERT-style `gelu`)
    return 0.5 * x * (1.0 + jnp.tanh(0.7978845608028654 * (x + 0.044715 * x * x * x)))


def rc_model_kernel(emb_ref, pool_neg_ref, ent_emb_ref, labels_oh_ref,
                    w_w_ref, b_w_ref, w_e_ref, b_e_ref,
                    w_c_ref, b_c_ref, w_cls_ref, b_cls_ref,
                    logits_ref, loss_ref):
    B, S, E = emb_ref.shape
    WH = w_w_ref.shape[1]
    f32 = jnp.float32

    emb = emb_ref[...]                                           # (B, S, E)

    # ---------- masked max-pooling over the three span types (mask == 1/2/3) ----------
    # pool_neg[k] is 0 where mask==k+1 and -1e9 elsewhere (lane-dense additive mask).
    def pool(k):
        return jnp.max(emb + pool_neg_ref[k][:, :, None], axis=1)    # (B, E)

    # Batch the three fc_w applications into one matmul: rows [0:B]=obj, [B:2B]=btwn, [2B:3B]=attr
    pooled = jnp.concatenate([pool(0), pool(1), pool(2)], axis=0)    # (3B, E)
    h_w = gelu(jnp.dot(pooled, w_w_ref[...], preferred_element_type=f32)
               + b_w_ref[...])                                       # (3B, WH)

    # ---------- entity branch ----------
    ent_h = gelu(jnp.dot(ent_emb_ref[...], w_e_ref[...], preferred_element_type=f32)
                 + b_e_ref[...])                                     # (B, EH)

    # ---------- fc_c, block-wise (avoids an in-kernel lane concatenation) ----------
    w_c = w_c_ref[...]                                               # (3*WH + EH, H)
    pre_c = (jnp.dot(h_w[0:B],       w_c[0:WH],        preferred_element_type=f32)
             + jnp.dot(h_w[B:2 * B], w_c[WH:2 * WH],   preferred_element_type=f32)
             + jnp.dot(h_w[2 * B:],  w_c[2 * WH:3 * WH], preferred_element_type=f32)
             + jnp.dot(ent_h,        w_c[3 * WH:],     preferred_element_type=f32)
             + b_c_ref[...])
    feat = gelu(pre_c)                                               # (B, H)

    # ---------- classifier ----------
    logits = (jnp.dot(feat, w_cls_ref[...], preferred_element_type=f32)
              + b_cls_ref[...])                                      # (B, 2)
    logits_ref[...] = logits

    # ---------- cross-entropy loss (mean over batch), all in f32 ----------
    mx = jnp.max(logits, axis=-1, keepdims=True)
    lse = jnp.log(jnp.sum(jnp.exp(logits - mx), axis=-1, keepdims=True)) + mx    # (B, 1)
    nll = lse - jnp.sum(labels_oh_ref[...] * logits, axis=-1, keepdims=True)     # (B, 1)
    loss_ref[...] = jnp.sum(nll, axis=0, keepdims=True) * (1.0 / B)              # (1, 1)


def rc_model_forward(inputs, masks, entities, labels, params):
    """inputs, masks: (batch, seq) int32; entities, labels: (batch,) int32.
    Returns (logits (batch, 2), scalar mean cross-entropy loss)."""
    B, S = inputs.shape
    f32 = jnp.float32

    # Glue (data-dependent gathers + mask prep) done in plain JAX:
    emb = params["word_emb"][inputs].astype(f32)                 # (B, S, E)
    ent_emb = params["ent_emb"][entities].astype(f32)            # (B, De)
    pool_neg = jnp.stack(
        [jnp.where(masks == k, 0.0, -1e9) for k in (1, 2, 3)], axis=0).astype(f32)  # (3, B, S)
    labels_oh = jax.nn.one_hot(labels, 2, dtype=f32)             # (B, 2)

    args = (emb, pool_neg, ent_emb, labels_oh,
            params["w_w"], params["b_w"], params["w_e"], params["b_e"],
            params["w_c"], params["b_c"], params["w_cls"], params["b_cls"])

    vmem = pl.BlockSpec(memory_space=pltpu.MemorySpace.VMEM)
    logits, loss = pl.pallas_call(
        rc_model_kernel,
        out_shape=(jax.ShapeDtypeStruct((B, 2), f32),
                   jax.ShapeDtypeStruct((1, 1), f32)),
        in_specs=[vmem] * len(args),
        out_specs=(vmem, vmem),
    )(*args)
    return logits, loss[0, 0]


def init_params(key, vocab_size, word_embedding_dim, entity_embedding_dim,
                entity_num, word_hidden_dim, entity_hidden_dim, hidden_dim):
    ks = jax.random.split(key, 10)

    def u(k, shape, fan_in):
        s = 1.0 / (fan_in ** 0.5)
        return jax.random.uniform(k, shape, minval=-s, maxval=s, dtype=jnp.float32)

    word_emb = 0.1 * jax.random.normal(ks[0], (vocab_size, word_embedding_dim), dtype=jnp.float32)
    word_emb = word_emb.at[1].set(0.0)          # padding_idx = 1
    ent_emb = 0.1 * jax.random.normal(ks[1], (entity_num, entity_embedding_dim), dtype=jnp.float32)
    feat_in = 3 * word_hidden_dim + entity_hidden_dim
    return dict(
        word_emb=word_emb,
        ent_emb=ent_emb,
        # Linear weights stored pre-transposed so the kernel computes y = x @ W + b
        w_w=u(ks[2], (word_embedding_dim, word_hidden_dim), word_embedding_dim),
        b_w=u(ks[3], (1, word_hidden_dim), word_embedding_dim),
        w_e=u(ks[4], (entity_embedding_dim, entity_hidden_dim), entity_embedding_dim),
        b_e=u(ks[5], (1, entity_hidden_dim), entity_embedding_dim),
        w_c=u(ks[6], (feat_in, hidden_dim), feat_in),
        b_c=u(ks[7], (1, hidden_dim), feat_in),
        w_cls=u(ks[8], (hidden_dim, 2), hidden_dim),
        b_cls=u(ks[9], (1, 2), hidden_dim),
    )


def reference_forward(inputs, masks, entities, labels, params):
    """Plain-JAX reference mirroring the PyTorch RcModel forward (eval-mode dropout,
    lstm_hidden_dim=0, use_attention=False)."""
    B = inputs.shape[0]
    emb = params["word_emb"][inputs]

    def pool(k):
        neg = jnp.where(masks == k, 0.0, -1e9)
        return jnp.max(emb + neg[:, :, None], axis=1)

    obj = gelu(pool(1) @ params["w_w"] + params["b_w"])
    btwn = gelu(pool(2) @ params["w_w"] + params["b_w"])
    attr = gelu(pool(3) @ params["w_w"] + params["b_w"])
    ent = gelu(params["ent_emb"][entities] @ params["w_e"] + params["b_e"])
    features = jnp.concatenate([obj, btwn, attr, ent], axis=-1)
    feat = gelu(features @ params["w_c"] + params["b_c"])
    logits = feat @ params["w_cls"] + params["b_cls"]
    lse = jax.scipy.special.logsumexp(logits, axis=-1)
    nll = lse - logits[jnp.arange(B), labels]
    return logits, jnp.mean(nll)


if __name__ == "__main__":
    key = jax.random.PRNGKey(0)
    vocab_size, word_embedding_dim = 32, 16
    entity_embedding_dim, entity_num = 8, 6
    word_hidden_dim, entity_hidden_dim, hidden_dim = 16, 8, 32
    batch, seq_len = 2, 16

    k1, k2, k3, k4, k5 = jax.random.split(key, 5)
    params = init_params(k1, vocab_size, word_embedding_dim, entity_embedding_dim,
                         entity_num, word_hidden_dim, entity_hidden_dim, hidden_dim)

    inputs = jax.random.randint(k2, (batch, seq_len), 2, vocab_size, dtype=jnp.int32)
    masks = jax.random.randint(k3, (batch, seq_len), 0, 4, dtype=jnp.int32)
    # Guarantee every batch element has at least one obj / btwn / attr token
    # (PyTorch would error on an empty span selection).
    masks = masks.at[:, 0].set(1).at[:, 1].set(2).at[:, 2].set(3)
    entities = jax.random.randint(k4, (batch,), 0, entity_num, dtype=jnp.int32)
    labels = jax.random.randint(k5, (batch,), 0, 2, dtype=jnp.int32)

    logits, loss = rc_model_forward(inputs, masks, entities, labels, params)
    logits = jax.block_until_ready(logits)
    loss = jax.block_until_ready(loss)

    ref_logits, ref_loss = reference_forward(inputs, masks, entities, labels, params)
    assert bool(jnp.all(jnp.isfinite(logits))) and bool(jnp.isfinite(loss)), \
        "kernel produced non-finite output"
    assert jnp.allclose(logits, ref_logits, rtol=1e-3, atol=1e-3), (logits, ref_logits)
    assert jnp.allclose(loss, ref_loss, rtol=1e-3, atol=1e-3), (loss, ref_loss)

    print("KERNEL_OK")
</pallas_src>

<mosaic_0001>
module attributes {stable_mosaic.version = 11 : i64} {
  func.func @rc_model_kernel(%arg0: memref<2x16x16xf32, #tpu.memory_space<vmem>>, %arg1: memref<3x2x16xf32, #tpu.memory_space<vmem>>, %arg2: memref<2x8xf32, #tpu.memory_space<vmem>>, %arg3: memref<2x2xf32, #tpu.memory_space<vmem>>, %arg4: memref<16x16xf32, #tpu.memory_space<vmem>>, %arg5: memref<1x16xf32, #tpu.memory_space<vmem>>, %arg6: memref<8x8xf32, #tpu.memory_space<vmem>>, %arg7: memref<1x8xf32, #tpu.memory_space<vmem>>, %arg8: memref<56x32xf32, #tpu.memory_space<vmem>>, %arg9: memref<1x32xf32, #tpu.memory_space<vmem>>, %arg10: memref<32x2xf32, #tpu.memory_space<vmem>>, %arg11: memref<1x2xf32, #tpu.memory_space<vmem>>, %arg12: memref<2x2xf32, #tpu.memory_space<vmem>>, %arg13: memref<1x1xf32, #tpu.memory_space<vmem>>) attributes {dimension_semantics = [], scalar_prefetch = 0 : i64, scratch_operands = 0 : i64, tpu.core_type = #tpu.core_type<tc>} {
    %c0 = arith.constant 0 : index
    %c0_0 = arith.constant 0 : index
    %c0_1 = arith.constant 0 : index
    %0 = vector.load %arg0[%c0, %c0_0, %c0_1] : memref<2x16x16xf32, #tpu.memory_space<vmem>>, vector<2x16x16xf32>
    %c0_2 = arith.constant 0 : index
    %c0_3 = arith.constant 0 : index
    %c0_4 = arith.constant 0 : index
    %1 = vector.load %arg1[%c0_2, %c0_3, %c0_4] : memref<3x2x16xf32, #tpu.memory_space<vmem>>, vector<1x2x16xf32>
    %2 = vector.shape_cast %1 : vector<1x2x16xf32> to vector<2x16xf32>
    %3 = vector.shape_cast %2 : vector<2x16xf32> to vector<2x16x1xf32>
    %4 = vector.broadcast %3 : vector<2x16x1xf32> to vector<2x16x16xf32>
    %5 = arith.addf %0, %4 : vector<2x16x16xf32>
    %cst = arith.constant dense<0xFF800000> : vector<2x16xf32>
    %6 = vector.multi_reduction <maximumf>, %5, %cst [1] : vector<2x16x16xf32> to vector<2x16xf32>
    %c1 = arith.constant 1 : index
    %c0_5 = arith.constant 0 : index
    %c0_6 = arith.constant 0 : index
    %7 = vector.load %arg1[%c1, %c0_5, %c0_6] : memref<3x2x16xf32, #tpu.memory_space<vmem>>, vector<1x2x16xf32>
    %8 = vector.shape_cast %7 : vector<1x2x16xf32> to vector<2x16xf32>
    %9 = vector.shape_cast %8 : vector<2x16xf32> to vector<2x16x1xf32>
    %10 = vector.broadcast %9 : vector<2x16x1xf32> to vector<2x16x16xf32>
    %11 = arith.addf %0, %10 : vector<2x16x16xf32>
    %cst_7 = arith.constant dense<0xFF800000> : vector<2x16xf32>
    %12 = vector.multi_reduction <maximumf>, %11, %cst_7 [1] : vector<2x16x16xf32> to vector<2x16xf32>
    %c2 = arith.constant 2 : index
    %c0_8 = arith.constant 0 : index
    %c0_9 = arith.constant 0 : index
    %13 = vector.load %arg1[%c2, %c0_8, %c0_9] : memref<3x2x16xf32, #tpu.memory_space<vmem>>, vector<1x2x16xf32>
    %14 = vector.shape_cast %13 : vector<1x2x16xf32> to vector<2x16xf32>
    %15 = vector.shape_cast %14 : vector<2x16xf32> to vector<2x16x1xf32>
    %16 = vector.broadcast %15 : vector<2x16x1xf32> to vector<2x16x16xf32>
    %17 = arith.addf %0, %16 : vector<2x16x16xf32>
    %cst_10 = arith.constant dense<0xFF800000> : vector<2x16xf32>
    %18 = vector.multi_reduction <maximumf>, %17, %cst_10 [1] : vector<2x16x16xf32> to vector<2x16xf32>
    %19 = tpu.concatenate %6, %12, %18 in 0 : vector<2x16xf32>, vector<2x16xf32>, vector<2x16xf32> -> vector<6x16xf32>
    %c0_11 = arith.constant 0 : index
    %c0_12 = arith.constant 0 : index
    %20 = vector.load %arg4[%c0_11, %c0_12] : memref<16x16xf32, #tpu.memory_space<vmem>>, vector<16x16xf32>
    %cst_13 = arith.constant dense<0.000000e+00> : vector<6x16xf32>
    %21 = tpu.matmul %19, %20, %cst_13 {dimension_numbers = #tpu.dot_dimension_numbers<[1], [0], [0], [1], [0, 0, 1, 1], [], []>} : vector<6x16xf32>, vector<16x16xf32>, vector<6x16xf32> -> vector<6x16xf32>
    %c0_14 = arith.constant 0 : index
    %c0_15 = arith.constant 0 : index
    %22 = vector.load %arg5[%c0_14, %c0_15] : memref<1x16xf32, #tpu.memory_space<vmem>>, vector<1x16xf32>
    %23 = vector.broadcast %22 : vector<1x16xf32> to vector<6x16xf32>
    %24 = arith.addf %21, %23 : vector<6x16xf32>
    %cst_16 = arith.constant 5.000000e-01 : f32
    %25 = vector.broadcast %cst_16 : f32 to vector<6x16xf32>
    %26 = arith.mulf %25, %24 : vector<6x16xf32>
    %cst_17 = arith.constant 4.471500e-02 : f32
    %27 = vector.broadcast %cst_17 : f32 to vector<6x16xf32>
    %28 = arith.mulf %27, %24 : vector<6x16xf32>
    %29 = arith.mulf %28, %24 : vector<6x16xf32>
    %30 = arith.mulf %29, %24 : vector<6x16xf32>
    %31 = arith.addf %24, %30 : vector<6x16xf32>
    %cst_18 = arith.constant 0.797884583 : f32
    %32 = vector.broadcast %cst_18 : f32 to vector<6x16xf32>
    %33 = arith.mulf %32, %31 : vector<6x16xf32>
    %34 = math.tanh %33 : vector<6x16xf32>
    %cst_19 = arith.constant 1.000000e+00 : f32
    %35 = vector.broadcast %cst_19 : f32 to vector<6x16xf32>
    %36 = arith.addf %35, %34 : vector<6x16xf32>
    %37 = arith.mulf %26, %36 : vector<6x16xf32>
    %c0_20 = arith.constant 0 : index
    %c0_21 = arith.constant 0 : index
    %38 = vector.load %arg2[%c0_20, %c0_21] : memref<2x8xf32, #tpu.memory_space<vmem>>, vector<2x8xf32>
    %c0_22 = arith.constant 0 : index
    %c0_23 = arith.constant 0 : index
    %39 = vector.load %arg6[%c0_22, %c0_23] : memref<8x8xf32, #tpu.memory_space<vmem>>, vector<8x8xf32>
    %cst_24 = arith.constant dense<0.000000e+00> : vector<2x8xf32>
    %40 = tpu.matmul %38, %39, %cst_24 {dimension_numbers = #tpu.dot_dimension_numbers<[1], [0], [0], [1], [0, 0, 1, 1], [], []>} : vector<2x8xf32>, vector<8x8xf32>, vector<2x8xf32> -> vector<2x8xf32>
    %c0_25 = arith.constant 0 : index
    %c0_26 = arith.constant 0 : index
    %41 = vector.load %arg7[%c0_25, %c0_26] : memref<1x8xf32, #tpu.memory_space<vmem>>, vector<1x8xf32>
    %42 = vector.broadcast %41 : vector<1x8xf32> to vector<2x8xf32>
    %43 = arith.addf %40, %42 : vector<2x8xf32>
    %cst_27 = arith.constant 5.000000e-01 : f32
    %44 = vector.broadcast %cst_27 : f32 to vector<2x8xf32>
    %45 = arith.mulf %44, %43 : vector<2x8xf32>
    %cst_28 = arith.constant 4.471500e-02 : f32
    %46 = vector.broadcast %cst_28 : f32 to vector<2x8xf32>
    %47 = arith.mulf %46, %43 : vector<2x8xf32>
    %48 = arith.mulf %47, %43 : vector<2x8xf32>
    %49 = arith.mulf %48, %43 : vector<2x8xf32>
    %50 = arith.addf %43, %49 : vector<2x8xf32>
    %cst_29 = arith.constant 0.797884583 : f32
    %51 = vector.broadcast %cst_29 : f32 to vector<2x8xf32>
    %52 = arith.mulf %51, %50 : vector<2x8xf32>
    %53 = math.tanh %52 : vector<2x8xf32>
    %cst_30 = arith.constant 1.000000e+00 : f32
    %54 = vector.broadcast %cst_30 : f32 to vector<2x8xf32>
    %55 = arith.addf %54, %53 : vector<2x8xf32>
    %56 = arith.mulf %45, %55 : vector<2x8xf32>
    %c0_31 = arith.constant 0 : index
    %c0_32 = arith.constant 0 : index
    %57 = vector.load %arg8[%c0_31, %c0_32] : memref<56x32xf32, #tpu.memory_space<vmem>>, vector<56x32xf32>
    %58 = vector.extract_strided_slice %37 {offsets = [0, 0], sizes = [2, 16], strides = [1, 1]} : vector<6x16xf32> to vector<2x16xf32>
    %59 = vector.extract_strided_slice %57 {offsets = [0, 0], sizes = [16, 32], strides = [1, 1]} : vector<56x32xf32> to vector<16x32xf32>
    %cst_33 = arith.constant dense<0.000000e+00> : vector<2x32xf32>
    %60 = tpu.matmul %58, %59, %cst_33 {dimension_numbers = #tpu.dot_dimension_numbers<[1], [0], [0], [1], [0, 0, 1, 1], [], []>} : vector<2x16xf32>, vector<16x32xf32>, vector<2x32xf32> -> vector<2x32xf32>
    %61 = vector.extract_strided_slice %37 {offsets = [2, 0], sizes = [2, 16], strides = [1, 1]} : vector<6x16xf32> to vector<2x16xf32>
    %62 = vector.extract_strided_slice %57 {offsets = [16, 0], sizes = [16, 32], strides = [1, 1]} : vector<56x32xf32> to vector<16x32xf32>
    %cst_34 = arith.constant dense<0.000000e+00> : vector<2x32xf32>
    %63 = tpu.matmul %61, %62, %cst_34 {dimension_numbers = #tpu.dot_dimension_numbers<[1], [0], [0], [1], [0, 0, 1, 1], [], []>} : vector<2x16xf32>, vector<16x32xf32>, vector<2x32xf32> -> vector<2x32xf32>
    %64 = arith.addf %60, %63 : vector<2x32xf32>
    %65 = vector.extract_strided_slice %37 {offsets = [4, 0], sizes = [2, 16], strides = [1, 1]} : vector<6x16xf32> to vector<2x16xf32>
    %66 = vector.extract_strided_slice %57 {offsets = [32, 0], sizes = [16, 32], strides = [1, 1]} : vector<56x32xf32> to vector<16x32xf32>
    %cst_35 = arith.constant dense<0.000000e+00> : vector<2x32xf32>
    %67 = tpu.matmul %65, %66, %cst_35 {dimension_numbers = #tpu.dot_dimension_numbers<[1], [0], [0], [1], [0, 0, 1, 1], [], []>} : vector<2x16xf32>, vector<16x32xf32>, vector<2x32xf32> -> vector<2x32xf32>
    %68 = arith.addf %64, %67 : vector<2x32xf32>
    %69 = vector.extract_strided_slice %57 {offsets = [48, 0], sizes = [8, 32], strides = [1, 1]} : vector<56x32xf32> to vector<8x32xf32>
    %cst_36 = arith.constant dense<0.000000e+00> : vector<2x32xf32>
    %70 = tpu.matmul %56, %69, %cst_36 {dimension_numbers = #tpu.dot_dimension_numbers<[1], [0], [0], [1], [0, 0, 1, 1], [], []>} : vector<2x8xf32>, vector<8x32xf32>, vector<2x32xf32> -> vector<2x32xf32>
    %71 = arith.addf %68, %70 : vector<2x32xf32>
    %c0_37 = arith.constant 0 : index
    %c0_38 = arith.constant 0 : index
    %72 = vector.load %arg9[%c0_37, %c0_38] : memref<1x32xf32, #tpu.memory_space<vmem>>, vector<1x32xf32>
    %73 = vector.broadcast %72 : vector<1x32xf32> to vector<2x32xf32>
    %74 = arith.addf %71, %73 : vector<2x32xf32>
    %cst_39 = arith.constant 5.000000e-01 : f32
    %75 = vector.broadcast %cst_39 : f32 to vector<2x32xf32>
    %76 = arith.mulf %75, %74 : vector<2x32xf32>
    %cst_40 = arith.constant 4.471500e-02 : f32
    %77 = vector.broadcast %cst_40 : f32 to vector<2x32xf32>
    %78 = arith.mulf %77, %74 : vector<2x32xf32>
    %79 = arith.mulf %78, %74 : vector<2x32xf32>
    %80 = arith.mulf %79, %74 : vector<2x32xf32>
    %81 = arith.addf %74, %80 : vector<2x32xf32>
    %cst_41 = arith.constant 0.797884583 : f32
    %82 = vector.broadcast %cst_41 : f32 to vector<2x32xf32>
    %83 = arith.mulf %82, %81 : vector<2x32xf32>
    %84 = math.tanh %83 : vector<2x32xf32>
    %cst_42 = arith.constant 1.000000e+00 : f32
    %85 = vector.broadcast %cst_42 : f32 to vector<2x32xf32>
    %86 = arith.addf %85, %84 : vector<2x32xf32>
    %87 = arith.mulf %76, %86 : vector<2x32xf32>
    %c0_43 = arith.constant 0 : index
    %c0_44 = arith.constant 0 : index
    %88 = vector.load %arg10[%c0_43, %c0_44] : memref<32x2xf32, #tpu.memory_space<vmem>>, vector<32x2xf32>
    %cst_45 = arith.constant dense<0.000000e+00> : vector<2x2xf32>
    %89 = tpu.matmul %87, %88, %cst_45 {dimension_numbers = #tpu.dot_dimension_numbers<[1], [0], [0], [1], [0, 0, 1, 1], [], []>} : vector<2x32xf32>, vector<32x2xf32>, vector<2x2xf32> -> vector<2x2xf32>
    %c0_46 = arith.constant 0 : index
    %c0_47 = arith.constant 0 : index
    %90 = vector.load %arg11[%c0_46, %c0_47] : memref<1x2xf32, #tpu.memory_space<vmem>>, vector<1x2xf32>
    %91 = vector.broadcast %90 : vector<1x2xf32> to vector<2x2xf32>
    %92 = arith.addf %89, %91 : vector<2x2xf32>
    %c0_48 = arith.constant 0 : index
    %c0_49 = arith.constant 0 : index
    %93 = vector.load %arg12[%c0_48, %c0_49] : memref<2x2xf32, #tpu.memory_space<vmem>>, vector<2x2xf32>
    tpu.vector_store %arg12[%c0_48, %c0_49], %92 {strides = array<i32>} : memref<2x2xf32, #tpu.memory_space<vmem>>, vector<2x2xf32>,
    %cst_50 = arith.constant dense<0xFF800000> : vector<2xf32>
    %94 = vector.multi_reduction <maximumf>, %92, %cst_50 [1] : vector<2x2xf32> to vector<2xf32>
    %95 = vector.shape_cast %94 : vector<2xf32> to vector<2x1xf32>
    %96 = vector.broadcast %95 : vector<2x1xf32> to vector<2x2xf32>
    %97 = arith.subf %92, %96 : vector<2x2xf32>
    %98 = math.exp %97 : vector<2x2xf32>
    %cst_51 = arith.constant dense<0.000000e+00> : vector<2xf32>
    %99 = vector.multi_reduction <add>, %98, %cst_51 [1] : vector<2x2xf32> to vector<2xf32>
    %100 = vector.shape_cast %99 : vector<2xf32> to vector<2x1xf32>
    %101 = math.log %100 : vector<2x1xf32>
    %102 = arith.addf %101, %95 : vector<2x1xf32>
    %c0_52 = arith.constant 0 : index
    %c0_53 = arith.constant 0 : index
    %103 = vector.load %arg3[%c0_52, %c0_53] : memref<2x2xf32, #tpu.memory_space<vmem>>, vector<2x2xf32>
    %104 = arith.mulf %103, %92 : vector<2x2xf32>
    %cst_54 = arith.constant dense<0.000000e+00> : vector<2xf32>
    %105 = vector.multi_reduction <add>, %104, %cst_54 [1] : vector<2x2xf32> to vector<2xf32>
    %106 = vector.shape_cast %105 : vector<2xf32> to vector<2x1xf32>
    %107 = arith.subf %102, %106 : vector<2x1xf32>
    %cst_55 = arith.constant dense<0.000000e+00> : vector<1xf32>
    %108 = vector.multi_reduction <add>, %107, %cst_55 [0] : vector<2x1xf32> to vector<1xf32>
    %109 = vector.shape_cast %108 : vector<1xf32> to vector<1x1xf32>
    %cst_56 = arith.constant 5.000000e-01 : f32
    %110 = vector.broadcast %cst_56 : f32 to vector<1x1xf32>
    %111 = arith.mulf %109, %110 : vector<1x1xf32>
    %c0_57 = arith.constant 0 : index
    %c0_58 = arith.constant 0 : index
    %112 = vector.load %arg13[%c0_57, %c0_58] : memref<1x1xf32, #tpu.memory_space<vmem>>, vector<1x1xf32>
    tpu.vector_store %arg13[%c0_57, %c0_58], %111 {strides = array<i32>} : memref<1x1xf32, #tpu.memory_space<vmem>>, vector<1x1xf32>,
    return
  }
}

</mosaic_0001>

<bundles_post_ra>
// kernel: tpu_custom_call.1
= control target key start
LH: loop header
LB: loop body
LE: loop exit
PB: predicated region body
PF: predicated region fallthrough
CT: control target
= control target key end

     0   :  { %19 = vsyncpa [#allocation3], 0  ;;  %v50_v0 = vlaneseq  ;;  %s1236_s0 = inlined_call_operand.vmem [shape: f32[2,16,16], index: 0, kind: input, shape index: {}]   ;;  %s1237_s1 = inlined_call_operand.vmem [shape: f32[3,2,16], index: 1, kind: input, shape index: {}]   ;;  %s1238_s2 = inlined_call_operand.vmem [shape: f32[2,8], index: 2, kind: input, shape index: {}]   ;;  %s1239_s3 = inlined_call_operand.vmem [shape: f32[2,2], index: 3, kind: input, shape index: {}]   ;;  %s1240_s4 = inlined_call_operand.vmem [shape: f32[16,16], index: 4, kind: input, shape index: {}]   ;;  %s1241_s5 = inlined_call_operand.vmem [shape: f32[1,16], index: 5, kind: input, shape index: {}]   ;;  %s1242_s6 = inlined_call_operand.vmem [shape: f32[8,8], index: 6, kind: input, shape index: {}]   ;;  %s1243_s7 = inlined_call_operand.vmem [shape: f32[1,8], index: 7, kind: input, shape index: {}]   ;;  %s1244_s8 = inlined_call_operand.vmem [shape: f32[56,32], index: 8, kind: input, shape index: {}]   ;;  %s1245_s9 = inlined_call_operand.vmem [shape: f32[1,32], index: 9, kind: input, shape index: {}]   ;;  %s1246_s10 = inlined_call_operand.vmem [shape: f32[32,2], index: 10, kind: input, shape index: {}]   ;;  %s1247_s11 = inlined_call_operand.vmem [shape: f32[1,2], index: 11, kind: input, shape index: {}]   ;;  %s1248_s12 = inlined_call_operand.hbm [shape: f32[2,2], index: 12, kind: output, shape index: {0}]   ;;  %s1249_s13 = inlined_call_operand.hbm [shape: f32[1,1], index: 13, kind: output, shape index: {1}]  }
   0x2   :  { %v51_v1 = vshrl.u32 %v50_v0, 7 }
   0x3   :  { %20 = vsyncpa [#allocation5], 0  ;;  %v49_v2 = vld [vmem:[%s1237_s1] sm:$0x3]  ;;  %v850_v7 = vld [vmem:[%s1237_s1 + $0x2] sm:$0x3] }
   0x4   :  { %v63_v3 = vsub.s32 1, %v51_v1  ;;  %v52_v4 = vsub.s32 0, %v51_v1  ;;  %v851_v10 = vld [vmem:[%s1237_s1 + $0x4] sm:$0x3]  ;;  %v207_v14 = vld [vmem:[%s1240_s4 + $0x8] sm:$0xff]  ;;  %v1014_v16 = vmov 0.0|0.0  }
   0x5   :  { %v206_v13 = vld [vmem:[%s1240_s4] sm:$0xff]  ;;  %933 = vmatprep.subr.bf16.mxu0 %v1014_v16  ;;  %vm1015_vm0 = vmmov 0   ;;  %v1016_v17 = vmov 0.0   ;;  %936 = vmatprep.subr.bf16.mxu1 %v1014_v16  ;;  %v47_v19 = vld [vmem:[%s1236_s0 + $0x10] sm:$0xff]  ;;  %v48_v22 = vld [vmem:[%s1236_s0 + $0x18] sm:$0xff]  ;;  %vm76_vm1 = vcmask 130048  }
   0x6   :  { %v64_v5 = vrot.slane %v49_v2, %v63_v3  ;;  %v53_v6 = vrot.slane %v49_v2, %v52_v4  ;;  %v100_v8 = vrot.slane %v850_v7, %v52_v4  ;;  %v111_v9 = vrot.slane %v850_v7, %v63_v3  ;;  %888 = vmatprep.mubr.msk.f32.mxu0 %vm1015_vm0, %v1016_v17  ;;  %v45_v21 = vld [vmem:[%s1236_s0] sm:$0xff]  ;;  %v46_v23 = vld [vmem:[%s1236_s0 + $0x8] sm:$0xff] }
   0x7   :  { %v146_v11 = vrot.slane %v851_v10, %v52_v4  ;;  %v157_v12 = vrot.slane %v851_v10, %v63_v3  ;;  %v934_v15 = vpack.c.bf16 %v207_v14, %v206_v13  ;;  %900 = vmatprep.mubr.msk.f32.mxu1 %vm1015_vm0, %v1016_v17  ;;  %vm194_vm2 = vcmask 1043459  }
   0x8   :  { %66 = vbcast.lane.b32.xlu1 %v64_v5, 256  ;;  %55 = vbcast.lane.b32.xlu0 %v53_v6, 256  ;;  %vm189_vm3 = vcmask 1041409   ;;  %vm199_vm4 = vcmask 1045509   ;;  %vm202_vm5 = vcmask 1041408   ;;  %vm204_vm6 = vcmask 1043456  }
   0x9   :  { %935 = vmatpush3.bf16.msra.mxu0 %v934_v15  ;;  %vm306_vm7 = vcmask 64512   ;;  %vm718_vm8 = vcmask 261120   ;;  %vm792_vm9 = vcmask 9216  }
   0xa   :  { %891 = vmatprep.subr.mxu0 %v1016_v17 }
   0xc   :  { %70 = vbcast.lane.b32.xlu1 %v64_v5, 264  ;;  %59 = vbcast.lane.b32.xlu0 %v53_v6, 264 }
  0x10   :  { %106 = vbcast.lane.b32.xlu1 %v100_v8, 264  ;;  %102 = vbcast.lane.b32.xlu0 %v100_v8, 256 }
  0x14   :  { %117 = vbcast.lane.b32.xlu1 %v111_v9, 264  ;;  %113 = vbcast.lane.b32.xlu0 %v111_v9, 256 }
  0x18   :  { %152 = vbcast.lane.b32.xlu1 %v146_v11, 264  ;;  %148 = vbcast.lane.b32.xlu0 %v146_v11, 256 }
  0x1c   :  { %163 = vbcast.lane.b32.xlu1 %v157_v12, 264  ;;  %159 = vbcast.lane.b32.xlu0 %v157_v12, 256 }
  0x7a   :  { %v67_v18 = vpop.permute.xlu1 %66  ;;  %v56_v20 = vpop.permute.xlu0 %55 }
  0x7b   :  { %v74_v24 = vadd.f32 %v67_v18, %v47_v19  ;;  %v72_v25 = vadd.f32 %v56_v20, %v45_v21 }
  0x7d   :  { %v86_v30 = vsel %vm76_vm1, %v74_v24, -inf  ;;  %v77_v31 = vsel %vm76_vm1, %v72_v25, -inf }
  0x7e   :  { %v71_v26 = vpop.permute.xlu1 %70  ;;  %v60_v27 = vpop.permute.xlu0 %59 }
  0x7f   :  { %v75_v28 = vadd.f32 %v71_v26, %v48_v22  ;;  %v73_v29 = vadd.f32 %v60_v27, %v46_v23 }
  0x81   :  { %v87_v32 = vsel %vm76_vm1, %v75_v28, -inf  ;;  %v78_v33 = vsel %vm76_vm1, %v73_v29, -inf }
  0x82   :  { %v88_v34 = vmax.f32 %v86_v30, %v87_v32  ;;  %v79_v35 = vmax.f32 %v77_v31, %v78_v33  ;;  %v107_v36 = vpop.permute.xlu1 %106  ;;  %v103_v37 = vpop.permute.xlu0 %102 }
  0x83   :  { %v120_v38 = vadd.f32 %v107_v36, %v46_v23  ;;  %v119_v39 = vadd.f32 %v103_v37, %v45_v21 }
  0x84   :  { %v89_v42 = vrot.slane %v88_v34, 4  ;;  %v80_v43 = vrot.slane %v79_v35, 4 }
  0x85   :  { %v124_v40 = vsel %vm76_vm1, %v120_v38, -inf  ;;  %v123_v41 = vsel %vm76_vm1, %v119_v39, -inf }
  0x86   :  { %v125_v44 = vmax.f32 %v123_v41, %v124_v40  ;;  %v118_v45 = vpop.permute.xlu1 %117  ;;  %v114_v46 = vpop.permute.xlu0 %113  ;;  %v90_v52 = vmax.f32 %v88_v34, %v89_v42  ;;  %v81_v53 = vmax.f32 %v79_v35, %v80_v43  ;;  %v298_v42 = vld [vmem:[%s1242_s6] sm:$0xff] }
  0x87   :  { %v122_v47 = vadd.f32 %v118_v45, %v48_v22  ;;  %v121_v48 = vadd.f32 %v114_v46, %v47_v19  ;;  %v389_v45 = vld [vmem:[%s1244_s8] sm:$0xff]  ;;  %v390_v46 = vld [vmem:[%s1244_s8 + $0x8] sm:$0xff] }
  0x88   :  { %v126_v49 = vrot.slane %v125_v44, 4  ;;  %v91_v63 = vrot.slane %v90_v52, 2  ;;  %v82_v0 = vrot.slane %v81_v53, 2 }
  0x89   :  { %v133_v50 = vsel %vm76_vm1, %v122_v47, -inf  ;;  %v132_v51 = vsel %vm76_vm1, %v121_v48, -inf  ;;  %v391_v47 = vld [vmem:[%s1244_s8 + $0x10] sm:$0xff]  ;;  %v940_v48 = vpack.c.bf16 %v390_v46, %v389_v45 }
  0x8a   :  { %v134_v54 = vmax.f32 %v132_v51, %v133_v50  ;;  %v153_v55 = vpop.permute.xlu1 %152  ;;  %v149_v56 = vpop.permute.xlu0 %148  ;;  %v127_v57 = vmax.f32 %v125_v44, %v126_v49  ;;  %v92_v14 = vmax.f32 %v90_v52, %v91_v63  ;;  %v83_v15 = vmax.f32 %v81_v53, %v82_v0  ;;  %v297_v44 = vld [vmem:[%s1238_s2] sm:$0x3]  ;;  %v392_v49 = vld [vmem:[%s1244_s8 + $0x18] sm:$0xff] }
  0x8b   :  { %v166_v58 = vadd.f32 %v153_v55, %v46_v23  ;;  %v165_v59 = vadd.f32 %v149_v56, %v45_v21  ;;  %v937_v50 = vpack.c.bf16 %v392_v49, %v391_v47  ;;  %v852_v51 = vld [vmem:[%s1241_s5] ss:$0 sm:$0xff] }
  0x8c   :  { %v135_v60 = vrot.slane %v134_v54, 4  ;;  %v128_v4 = vrot.slane %v127_v57, 2  ;;  %v93_v26 = vrot.slane %v92_v14, 1  ;;  %v84_v27 = vrot.slane %v83_v15, 1  ;;  %v854_v55 = vld [vmem:[%s1243_s7] ss:$0 sm:$0xff] }
  0x8d   :  { %v170_v61 = vsel %vm76_vm1, %v166_v58, -inf  ;;  %v169_v62 = vsel %vm76_vm1, %v165_v59, -inf  ;;  %938 = vmatpush3.bf16.msra.mxu1 %v937_v50  ;;  %v861_v47 = vld [vmem:[%s1247_s11] ss:$0 sm:$0xff]  ;;  %s1017_s11 = smov [#allocation2]  }
  0x8e   :  { %v136_v1 = vmax.f32 %v134_v54, %v135_v60  ;;  %v164_v2 = vpop.permute.xlu1 %163  ;;  %v160_v3 = vpop.permute.xlu0 %159  ;;  %v171_v5 = vmax.f32 %v169_v62, %v170_v61  ;;  %v129_v18 = vmax.f32 %v127_v57, %v128_v4  ;;  %v94_v32 = vmax.f32 %v92_v14, %v93_v26  ;;  %942 = vmatprep.subr.bf16.mxu1 %v1014_v16  ;;  %v806_v49 = vld [vmem:[%s1239_s3] sm:$0x3]  ;;  %s828_s14 = sshll.u32 %s1017_s11, 4  ;;  %s829_s14 = int_to_ptr.vmem [resolvable:$true] %s828_s14 }
  0x8f   :  { %v168_v6 = vadd.f32 %v164_v2, %v48_v22  ;;  %v167_v7 = vadd.f32 %v160_v3, %v47_v19  ;;  %v85_v33 = vmax.f32 %v83_v15, %v84_v27  ;;  %v710_v27 = vld [vmem:[%s1246_s10 + $0x18] sm:$0xff]  ;;  %s966_s2 = scalar_lea.vmem %s829_s14, 32  ;;  %p971_p1 = scmp.lt.s32.totalorder %s829_s14, %s829_s14 }
  0x90   :  { %v137_v8 = vrot.slane %v136_v1, 2  ;;  %v172_v9 = vrot.slane %v171_v5, 4  ;;  %v130_v22 = vrot.slane %v129_v18, 1  ;;  %p967_p0 = scmp.ne.s32.totalorder %s829_s14, %s966_s2  ;;  %p972_p2 = scmp.lt.s32.totalorder %s966_s2, %s966_s2 }
  0x91   :  { %v179_v10 = vsel %vm76_vm1, %v168_v6, -inf  ;;  %v178_v11 = vsel %vm76_vm1, %v167_v7, -inf  ;;  %v190_v39 = vsel %vm189_vm3, %v94_v32, %v85_v33 }
  0x92   :  { %v138_v12 = vmax.f32 %v136_v1, %v137_v8  ;;  %v180_v13 = vmax.f32 %v178_v11, %v179_v10  ;;  %v173_v20 = vmax.f32 %v171_v5, %v172_v9  ;;  %v131_v34 = vmax.f32 %v129_v18, %v130_v22  ;;  %v393_v8 = vld [vmem:[%s1244_s8 + $0x20] sm:$0xff]  ;;  %v394_v9 = vld [vmem:[%s1244_s8 + $0x28] sm:$0xff]  ;;  %v395_v11 = vld [vmem:[%s1244_s8 + $0x30] sm:$0xff]  ;;  %p973_p3 = por %p972_p2, %p971_p1 }
  0x94   :  { %v181_v21 = vrot.slane %v180_v13, 4  ;;  %v139_v23 = vrot.slane %v138_v12, 1  ;;  %v174_v24 = vrot.slane %v173_v20, 2  ;;  %p974_p4 = pnand %p973_p3, %p967_p0 }
  0x96   :  { %v182_v25 = vmax.f32 %v180_v13, %v181_v21  ;;  %v175_v19 = vmax.f32 %v173_v20, %v174_v24  ;;  %v140_v29 = vmax.f32 %v138_v12, %v139_v23  ;;  %v943_v13 = vpack.c.bf16 %v394_v9, %v393_v8  ;;  %v707_v23 = vld [vmem:[%s1246_s10] sm:$0xff]  ;;  %v708_v24 = vld [vmem:[%s1246_s10 + $0x8] sm:$0xff] }
  0x97   :  { %v946_v26 = vpack.c.bf16 %v708_v24, %v707_v23 }
  0x98   :  { %v183_v28 = vrot.slane %v182_v25, 2  ;;  %v176_v30 = vrot.slane %v175_v19, 1  ;;  %v195_v36 = vsel %vm194_vm2, %v140_v29, %v131_v34 }
  0x99   :  { %v203_v41 = vsel %vm202_vm5, %v190_v39, %v195_v36  ;;  %v860_v36 = vld [vmem:[%s1245_s9] ss:$0 sm:$0xff] }
  0x9a   :  { %v184_v31 = vmax.f32 %v182_v25, %v183_v28  ;;  %v177_v37 = vmax.f32 %v175_v19, %v176_v30  ;;  %v709_v25 = vld [vmem:[%s1246_s10 + $0x10] sm:$0xff] }
  0x9b   :  { %v949_v22 = vpack.c.bf16 %v710_v27, %v709_v25 }
  0x9c   :  { %v185_v35 = vrot.slane %v184_v31, 1 }
  0x9e   :  { %v186_v38 = vmax.f32 %v184_v31, %v185_v35 }
  0xa0   :  { %v200_v40 = vsel %vm199_vm4, %v186_v38, %v177_v37 }
  0xa1   :  { %v205_v43 = vsel %vm204_vm6, %v203_v41, %v200_v40 }
  0xa2   :  { %889 = vmatmul.mubr.msk.f32.vlgmr.msra.gmra.mrb[0].mxu0 %vm76_vm1, %v205_v43 }
  0xa3   :  { %892 = vmatpush3.msra.mxu0 %v298_v42  ;;  %893 = vmatprep.mubr.msk.f32.mxu0 %vm1015_vm0, %v1016_v17 }
  0xa4   :  { %939 = vmatprep.subr.bf16.mxu0 %v1014_v16 }
  0xa6   :  { %894 = vmatmul.mubr.msk.f32.vlgmr.msra.gmra.mrb[2].mxu0 %vm306_vm7, %v297_v44 }
  0xa7   :  { %907 = vmatprep.mubr.msk.f32.mxu0 %vm1015_vm0, %v1016_v17  ;;  %941 = vmatpush3.bf16.msra.mxu0 %v940_v48 }
  0xa8   :  { %917 = vmatprep.subr.mxu0 %v1016_v17 }
 0x175   :  { %v284_v52 = vpop.f32.mrb[0].mxu0 }
 0x176   :  { %v285_v53 = vadd.f32 %v852_v51, %v284_v52  ;;  %v890_v54 = vpop.f32.mrb[1].mxu0 }
 0x178   :  { %v289_v56 = vmul.f32 0.044715, %v285_v53  ;;  %v288_v6 = vmul.f32 0.5, %v285_v53 }
 0x179   :  { %v376_v57 = vpop.f32.mrb[2].mxu0 }
 0x17a   :  { %v290_v58 = vmul.f32 %v289_v56, %v285_v53  ;;  %v377_v59 = vadd.f32 %v854_v55, %v376_v57  ;;  %v895_v60 = vpop.f32.mrb[3].mxu0 }
 0x17c   :  { %v291_v61 = vmul.f32 %v290_v58, %v285_v53  ;;  %v381_v62 = vmul.f32 0.044715, %v377_v59  ;;  %v380_v14 = vmul.f32 0.5, %v377_v59 }
 0x17e   :  { %v292_v63 = vadd.f32 %v291_v61, %v285_v53  ;;  %v382_v0 = vmul.f32 %v381_v62, %v377_v59 }
 0x180   :  { %v293_v1 = vmul.f32 0.7978846, %v292_v63  ;;  %v383_v2 = vmul.f32 %v382_v0, %v377_v59 }
 0x182   :  { %956 = vtanh.f32 %v293_v1  ;;  %v384_v3 = vadd.f32 %v383_v2, %v377_v59 }
 0x184   :  { %v385_v4 = vmul.f32 0.7978846, %v384_v3 }
 0x186   :  { %958 = vtanh.f32 %v385_v4 }
 0x18c   :  { %v957_v5 = vpop.eup %956 }
 0x18d   :  { %v295_v7 = vadd.f32 1.0, %v957_v5 }
 0x18f   :  { %v296_v10 = vmul.f32 %v295_v7, %v288_v6 }
 0x190   :  { %v959_v12 = vpop.eup %958 }
 0x191   :  { %908 = vmatmul.mubr.msk.f32.vlgmr.msra.gmra.mrb[4].mxu0 %vm76_vm1, %v296_v10  ;;  %v397_v15 = vrot.slane %v296_v10, 2  ;;  %v387_v18 = vadd.f32 1.0, %v959_v12  ;;  %v542_v21 = vrot.slane %v296_v10, 4 }
 0x192   :  { %918 = vmatpush3.msra.mxu0 %v395_v11  ;;  %919 = vmatprep.mubr.msk.f32.mxu0 %vm1015_vm0, %v1016_v17 }
 0x193   :  { %901 = vmatmul.mubr.msk.f32.vlgmr.msra.gmra.mrb[0].mxu1 %vm76_vm1, %v397_v15  ;;  %v388_v20 = vmul.f32 %v387_v18, %v380_v14 }
 0x194   :  { %944 = vmatpush3.bf16.msra.mxu1 %v943_v13  ;;  %914 = vmatprep.mubr.msk.f32.mxu1 %vm1015_vm0, %v1016_v17 }
 0x195   :  { %920 = vmatmul.mubr.msk.f32.vlgmr.msra.gmra.mrb[6].mxu0 %vm306_vm7, %v388_v20  ;;  %945 = vmatprep.subr.bf16.mxu1 %v1014_v16 }
 0x197   :  { %915 = vmatmul.mubr.msk.f32.vlgmr.msra.gmra.mrb[2].mxu1 %vm76_vm1, %v542_v21 }
 0x198   :  { %930 = vmatprep.mubr.msk.f32.mxu1 %vm1015_vm0, %v1016_v17  ;;  %947 = vmatpush3.bf16.msra.mxu1 %v946_v26 }
 0x199   :  { %948 = vmatprep.subr.bf16.mxu1 %v1014_v16 }
 0x19c   :  { %950 = vmatpush3.bf16.msra.mxu1 %v949_v22 }
 0x264   :  { %v538_v17 = vpop.f32.mrb[4].mxu0 }
 0x265   :  { %v909_v19 = vpop.f32.mrb[5].mxu0 }
 0x266   :  { %v466_v28 = vpop.f32.mrb[0].mxu1 }
 0x267   :  { %v539_v29 = vadd.f32 %v538_v17, %v466_v28  ;;  %v902_v30 = vpop.f32.mrb[1].mxu1 }
 0x268   :  { %v685_v31 = vpop.f32.mrb[6].mxu0 }
 0x269   :  { %v921_v32 = vpop.f32.mrb[7].mxu0 }
 0x26a   :  { %v611_v33 = vpop.f32.mrb[2].mxu1 }
 0x26b   :  { %v615_v34 = vadd.f32 %v611_v33, %v539_v29  ;;  %v916_v35 = vpop.f32.mrb[3].mxu1 }
 0x26d   :  { %v689_v37 = vadd.f32 %v685_v31, %v615_v34 }
 0x26f   :  { %v697_v38 = vadd.f32 %v860_v36, %v689_v37 }
 0x271   :  { %v699_v39 = vmul.f32 0.044715, %v697_v38  ;;  %v698_v44 = vmul.f32 0.5, %v697_v38 }
 0x273   :  { %v700_v40 = vmul.f32 %v699_v39, %v697_v38 }
 0x275   :  { %v701_v16 = vmul.f32 %v700_v40, %v697_v38 }
 0x277   :  { %v702_v41 = vadd.f32 %v701_v16, %v697_v38 }
 0x279   :  { %v703_v42 = vmul.f32 0.7978846, %v702_v41 }
 0x27b   :  { %960 = vtanh.f32 %v703_v42 }
 0x285   :  { %v961_v43 = vpop.eup %960 }
 0x286   :  { %v705_v45 = vadd.f32 1.0, %v961_v43 }
 0x288   :  { %v706_v46 = vmul.f32 %v705_v45, %v698_v44 }
 0x28a   :  { %931 = vmatmul.mubr.msk.f32.vlgmr.msra.gmra.mrb[4].mxu1 %vm718_vm8, %v706_v46 }
 0x35d   :  { %v788_v48 = vpop.f32.mrb[4].mxu1 }
 0x35e   :  { %v789_v50 = vadd.f32 %v861_v47, %v788_v48  ;;  %v932_v51 = vpop.f32.mrb[5].mxu1 }
 0x360   :  { %v794_v52 = vsel %vm792_vm9, %v789_v50, -inf  ;;  %793 = vst.msk [vmem:[#allocation2] sm:$0x3] %vm792_vm9, %v789_v50  ;;  %v807_v53 = vmul.f32 %v806_v49, %v789_v50 }
 0x361   :  { %795 = vmax.xlane.f32.xlu0 %v794_v52 }
 0x362   :  { %v808_v54 = vsel %vm792_vm9, %v807_v53, 0.0 }
 0x365   :  { %809 = vadd.xlane.f32.xlu0 %v808_v54 }
 0x3ee   :  { %v796_v55 = vpop.xlane.xlu0 %795 }
 0x3ef   :  { %v797_v56 = vsub.f32 %v789_v50, %v796_v55 }
 0x3f1   :  { %v798_v57 = vmul.f32 1.442695, %v797_v56 }
 0x3f3   :  { %962 = vpow2.f32 %v798_v57 }
 0x3fd   :  { %v963_v58 = vpop.eup %962 }
 0x3fe   :  { %v800_v59 = vsel %vm792_vm9, %v963_v58, 0.0 }
 0x3ff   :  { %801 = vadd.xlane.f32.xlu1 %v800_v59 }
 0x400   :  { %977 = shalt.err (!%p974_p4)
}
 0x401   :  { %s978_s16 = scalar_lea.hbm %s1248_s12, 32 }
 0x402   :  { %p979_p5 = scmp.ne.s32.totalorder %s1248_s12, %s978_s16  ;;  %p982_p6 = scmp.lt.u32.totalorder %s978_s16, %s1248_s12 }
 0x404   :  { %p984_p7 = pnand %p982_p6, %p979_p5 }
 0x406   :  { %987 = shalt.err (!%p984_p7)
}
 0x407   :  { %831 = dma.vmem_to_hbm [thread:$0]  %s829_s14, 32, %s1248_s12, [#allocation3]   ;;  %v810_v0 = vpop.xlane.xlu0 %809  ;;  %vm820_vm10 = vcmask 0  }
 0x408   :  { %s1018_s19 = smov [#allocation4]  }
 0x409   :  { %s838_s20 = sshll.u32 %s1018_s19, 4  ;;  %s839_s20 = int_to_ptr.vmem [resolvable:$true] %s838_s20 }
 0x40a   :  { %s988_s12 = scalar_lea.vmem %s839_s20, 16  ;;  %s992_s21 = scalar_lea.vmem %s839_s20, 32 }
 0x40b   :  { %p989_p8 = scmp.ne.s32.totalorder %s839_s20, %s988_s12  ;;  %p993_p9 = scmp.lt.s32.totalorder %s839_s20, %s839_s20 }
 0x40c   :  { %p994_p10 = scmp.lt.s32.totalorder %s992_s21, %s988_s12 }
 0x40e   :  { %p995_p11 = por %p994_p10, %p993_p9 }
 0x410   :  { %p996_p12 = pnand %p995_p11, %p989_p8 }
 0x48c   :  { %v802_v60 = vpop.xlane.xlu1 %801 }
 0x48d   :  { %964 = vlog2.f32 %v802_v60 }
 0x497   :  { %v965_v61 = vpop.eup %964 }
 0x498   :  { %v804_v62 = vmul.f32 0.6931472, %v965_v61 }
 0x49a   :  { %v805_v63 = vadd.f32 %v804_v62, %v796_v55 }
 0x49c   :  { %v811_v1 = vsub.f32 %v805_v63, %v810_v0 }
 0x49e   :  { %v812_v2 = vsel %vm202_vm5, %v811_v1, 0.0 }
 0x49f   :  { %v813_v3 = vrot.slane %v812_v2, 4 }
 0x4a1   :  { %v814_v4 = vadd.f32 %v813_v3, %v812_v2 }
 0x4a3   :  { %v815_v5 = vrot.slane %v814_v4, 2 }
 0x4a5   :  { %v816_v6 = vadd.f32 %v815_v5, %v814_v4 }
 0x4a7   :  { %v817_v7 = vrot.slane %v816_v6, 1 }
 0x4a9   :  { %v818_v8 = vadd.f32 %v817_v7, %v816_v6 }
 0x4ab   :  { %v819_v9 = vmul.f32 0.5, %v818_v8 }
 0x4ad   :  { %821 = vst.msk [vmem:[#allocation4] sm:$0x1] %vm820_vm10, %v819_v9 }
 0x4ae   :  { %999 = shalt.err (!%p996_p12)
}
 0x4af   :  { %s1000_s23 = scalar_lea.hbm %s1249_s13, 16 }
 0x4b0   :  { %p1001_p13 = scmp.ne.s32.totalorder %s1249_s13, %s1000_s23  ;;  %p1004_p0 = scmp.lt.u32.totalorder %s1000_s23, %s1249_s13 }
 0x4b2   :  { %p1006_p1 = pnand %p1004_p0, %p1001_p13 }
 0x4b4   :  { %1009 = shalt.err (!%p1006_p1)
}
 0x4b5   :  { %841 = dma.vmem_to_hbm [thread:$0]  %s839_s20, 16, %s1249_s13, [#allocation5]  }
 0x4b6   :  { %1010 = dma.done.wait [#allocation3], 32  }
 0x4b7   :  { %1011 = vsyncadd [#allocation3], 4294967264 }
 0x4b8   :  { %1012 = dma.done.wait [#allocation5], 16  }
 0x4b9   :  { %1013 = vsyncadd [#allocation5], 4294967280 }
 0x4ba   :  { %848 = vsyncpa [#allocation3], 1 }
 0x4bb   :  { %849 = vsyncpa [#allocation5], 1 }

</bundles_post_ra>
